<compile_context>
chip_gen: v7x
topology: tpu7x:2x2x1
jax: 0.10.0
libtpu: 0.0.40
codegen_flags: <defaults>
</compile_context>

<pallas_src>
import jax
import jax.numpy as jnp
from jax.experimental import pallas as pl
from jax.experimental.pallas import tpu as pltpu

# Lane-dense column widths we try (multiples of 128 -> unmasked vst stores).
_COL_CHOICES = (512, 256, 128)
_MIN_TILE_BYTES = 1 << 20          # never let a (split) tile drop below ~1 MiB

# Per-generation tuning: (target tile bytes, vmem_limit_bytes or None).
_GEN_TUNING = {
    "v5e": (2 << 20, None),        # 8 MiB footprint  < 16 MiB scoped default
    "v6e": (4 << 20, None),        # 16 MiB footprint < 32 MiB scoped default
    "v7x": (8 << 20, 48 << 20),    # 32 MiB footprint; raise scoped limit
}


def _tpu_generation():
    """Best-effort TPU generation detection; falls back to the most conservative tuning."""
    try:
        kind = jax.devices()[0].device_kind.lower()
    except Exception:
        return "v5e"
    if "v7" in kind or "7x" in kind:
        return "v7x"
    if "v6" in kind:
        return "v6e"
    return "v5e"                    # v5e / unknown: conservative tiles, default VMEM limit


def _affine_kernel(w_ref, b_ref, x_ref, o_ref):
    # w_ref, b_ref: (1, 1) f32 scalars in SMEM.  x_ref / o_ref: (tm, cols) VMEM tiles.
    w = w_ref[0, 0]
    b = b_ref[0, 0]
    o_ref[...] = (x_ref[...].astype(jnp.float32) * w + b).astype(o_ref.dtype)


def _round_down8(n):
    return (n // 8) * 8


def _round_up8(n):
    return ((n + 7) // 8) * 8


def _choose_tm(rows, row_bytes, target_tile_bytes):
    """Pick the row tile: large enough to amortize the ~0.35us per-step cost,
    8-aligned, and split into >=2 grid steps (megacore + DMA overlap) whenever
    each piece stays >= ~1 MiB."""
    tm = max(8, _round_down8(target_tile_bytes // row_bytes))
    if tm < rows:
        return tm
    # Whole array fits in one target-sized tile: split in two if worthwhile.
    half = _round_up8((rows + 1) // 2)
    if 8 <= half < rows and half * row_bytes >= _MIN_TILE_BYTES:
        return half
    return rows                     # single step, full-extent block


def _affine_2d(x2, w_s, b_s, target_tile_bytes, vmem_limit_bytes):
    rows, cols = x2.shape
    itemsize = jnp.dtype(x2.dtype).itemsize
    tm = _choose_tm(rows, cols * itemsize, target_tile_bytes)
    grid = (pl.cdiv(rows, tm),)
    return pl.pallas_call(
        _affine_kernel,
        out_shape=jax.ShapeDtypeStruct((rows, cols), x2.dtype),
        grid=grid,
        in_specs=[
            pl.BlockSpec(memory_space=pltpu.SMEM),            # w scalar (1,1) f32
            pl.BlockSpec(memory_space=pltpu.SMEM),            # b scalar (1,1) f32
            pl.BlockSpec((tm, cols), lambda i: (i, 0)),       # x row-tile
        ],
        out_specs=pl.BlockSpec((tm, cols), lambda i: (i, 0)),
        compiler_params=pltpu.CompilerParams(
            dimension_semantics=("parallel",),                # shard rows across TCs
            vmem_limit_bytes=vmem_limit_bytes,
        ),
        cost_estimate=pl.CostEstimate(
            flops=2 * rows * cols,
            transcendentals=0,
            bytes_accessed=2 * rows * cols * itemsize,
        ),
    )(w_s, b_s, x2)


def linear_forward(x, w, b):
    """y = w * x + b elementwise, with scalar w and b (each shape (1,)). Any x shape."""
    if not jnp.issubdtype(x.dtype, jnp.floating):
        raise TypeError("linear_forward expects a floating-point input (got %s)" % x.dtype)

    orig_shape = x.shape
    total = int(x.size)
    if total == 0:
        return x

    target_tile_bytes, vmem_limit_bytes = _GEN_TUNING[_tpu_generation()]

    # Parameters: (1,1) f32 in SMEM; compute happens in f32, cast back on store.
    w_s = jnp.reshape(w, (1, 1)).astype(jnp.float32)
    b_s = jnp.reshape(b, (1, 1)).astype(jnp.float32)

    # Fast path: total divisible by a lane-dense width -> zero-copy reshape
    # (pure bitcast), one HBM read + one HBM write of x, nothing else.
    for cols in _COL_CHOICES:
        if total % cols == 0:
            x2 = x.reshape(total // cols, cols)
            y2 = _affine_2d(x2, w_s, b_s, target_tile_bytes, vmem_limit_bytes)
            return y2.reshape(orig_shape)

    # Ragged fallback (total % 128 != 0, rare): kernel on the 512-aligned bulk,
    # tiny JAX affine on the <512-element tail.  No full-array pad round-trip.
    xf = jnp.ravel(x)
    w32 = w_s[0, 0]
    b32 = b_s[0, 0]
    bulk = (total // _COL_CHOICES[0]) * _COL_CHOICES[0]
    if bulk == 0:
        # Tiny ragged input: not worth a kernel launch.
        yf = (xf.astype(jnp.float32) * w32 + b32).astype(x.dtype)
        return yf.reshape(orig_shape)
    y_bulk = _affine_2d(
        xf[:bulk].reshape(-1, _COL_CHOICES[0]), w_s, b_s,
        target_tile_bytes, vmem_limit_bytes,
    ).reshape(-1)
    y_tail = (xf[bulk:].astype(jnp.float32) * w32 + b32).astype(x.dtype)
    return jnp.concatenate([y_bulk, y_tail]).reshape(orig_shape)


if __name__ == "__main__":
    key = jax.random.PRNGKey(0)
    kx, kw, kb, kx2 = jax.random.split(key, 4)

    # Parameters: torch.rand(1) ~ Uniform[0, 1), shape (1,).
    w = jax.random.uniform(kw, (1,), dtype=jnp.float32)
    b = jax.random.uniform(kb, (1,), dtype=jnp.float32)

    # Small 4-D input (aligned fast path): 2*4*16*16 = 2048 elements.
    x = jax.random.normal(kx, (2, 4, 16, 16), dtype=jnp.float32)
    y = jax.block_until_ready(linear_forward(x, w, b))
    y_ref = w[0] * x + b[0]
    assert y.shape == x.shape and y.dtype == x.dtype
    assert jnp.allclose(y, y_ref, atol=1e-6), "mismatch vs reference (aligned path)"

    # Small ragged input (3*7*31 = 651 elements) exercising the bulk+tail path.
    x_r = jax.random.normal(kx2, (3, 7, 31), dtype=jnp.float32)
    y_r = jax.block_until_ready(linear_forward(x_r, w, b))
    y_r_ref = w[0] * x_r + b[0]
    assert y_r.shape == x_r.shape and y_r.dtype == x_r.dtype
    assert jnp.allclose(y_r, y_r_ref, atol=1e-6), "mismatch vs reference (ragged path)"

    print("KERNEL_OK")
</pallas_src>

<mosaic_0001>
module attributes {stable_mosaic.version = 11 : i64} {
  func.func @_affine_kernel(%arg0: i32, %arg1: memref<1x1xf32, #tpu.memory_space<smem>>, %arg2: memref<1x1xf32, #tpu.memory_space<smem>>, %arg3: memref<4x512xf32, #tpu.memory_space<vmem>>, %arg4: memref<4x512xf32, #tpu.memory_space<vmem>>) attributes {dimension_semantics = [#tpu.dimension_semantics<parallel>], iteration_bounds = array<i64: 1>, scalar_prefetch = 0 : i64, scratch_operands = 0 : i64, tpu.core_type = #tpu.core_type<tc>, window_params = [{transform_indices = @transform_0, window_bounds = array<i64: 1, 1>}, {transform_indices = @transform_1, window_bounds = array<i64: 1, 1>}, {transform_indices = @transform_2, window_bounds = array<i64: 4, 512>}, {transform_indices = @transform_3, window_bounds = array<i64: 4, 512>}]} {
    %c0 = arith.constant 0 : index
    %c0_0 = arith.constant 0 : index
    %0 = memref.load %arg1[%c0, %c0_0] : memref<1x1xf32, #tpu.memory_space<smem>>
    %c0_1 = arith.constant 0 : index
    %c0_2 = arith.constant 0 : index
    %1 = memref.load %arg2[%c0_1, %c0_2] : memref<1x1xf32, #tpu.memory_space<smem>>
    %c0_3 = arith.constant 0 : index
    %c0_4 = arith.constant 0 : index
    %2 = vector.load %arg3[%c0_3, %c0_4] : memref<4x512xf32, #tpu.memory_space<vmem>>, vector<4x512xf32>
    %3 = vector.broadcast %0 : f32 to vector<4x512xf32>
    %4 = arith.mulf %2, %3 : vector<4x512xf32>
    %5 = vector.broadcast %1 : f32 to vector<4x512xf32>
    %6 = arith.addf %4, %5 : vector<4x512xf32>
    %c0_5 = arith.constant 0 : index
    %c0_6 = arith.constant 0 : index
    %7 = vector.load %arg4[%c0_5, %c0_6] : memref<4x512xf32, #tpu.memory_space<vmem>>, vector<4x512xf32>
    tpu.vector_store %arg4[%c0_5, %c0_6], %6 {strides = array<i32>} : memref<4x512xf32, #tpu.memory_space<vmem>>, vector<4x512xf32>,
    return
  }
  func.func @transform_0(%arg0: i32) -> (i32, i32) {
    %c0_i32 = arith.constant 0 : i32
    %c0_i32_0 = arith.constant 0 : i32
    %c0_i32_1 = arith.constant 0 : i32
    return %c0_i32, %c0_i32_0 : i32, i32
  }
  func.func @transform_1(%arg0: i32) -> (i32, i32) {
    %c0_i32 = arith.constant 0 : i32
    %c0_i32_0 = arith.constant 0 : i32
    %c0_i32_1 = arith.constant 0 : i32
    return %c0_i32, %c0_i32_0 : i32, i32
  }
  func.func @transform_2(%arg0: i32) -> (i32, i32) {
    %c0_i32 = arith.constant 0 : i32
    %c0_i32_0 = arith.constant 0 : i32
    return %arg0, %c0_i32 : i32, i32
  }
  func.func @transform_3(%arg0: i32) -> (i32, i32) {
    %c0_i32 = arith.constant 0 : i32
    %c0_i32_0 = arith.constant 0 : i32
    return %arg0, %c0_i32 : i32, i32
  }
}

</mosaic_0001>

<bundles_post_ra>
// kernel: tpu_custom_call.1
= control target key start
LH: loop header
LB: loop body
LE: loop exit
PB: predicated region body
PF: predicated region fallthrough
CT: control target
= control target key end

     0   :  { %10 = vsyncpa [#allocation5], 0  ;;  %s158_s0 = inlined_call_operand.<no memory space> [shape: f32[1,1], index: 0, kind: input, shape index: {}]   ;;  %s159_s1 = inlined_call_operand.<no memory space> [shape: f32[1,1], index: 1, kind: input, shape index: {}]   ;;  %s160_s2 = inlined_call_operand.hbm [shape: f32[4,512], index: 2, kind: input, shape index: {}]   ;;  %s161_s3 = inlined_call_operand.hbm [shape: f32[4,512], index: 3, kind: output, shape index: {}]  }
   0x1   :  { %11 = vsyncpa [#allocation6], 0  ;;  %s106_s12 = smov [#allocation4]   ;;  %s58_s16 = scalar_lea.hbm %s160_s2, 256 }
   0x2   :  { %s22_s13 = sshll.u32 %s106_s12, 4  ;;  %p59_p0 = scmp.ne.s32.totalorder %s160_s2, %s58_s16  ;;  %s23_s13 = int_to_ptr.vmem [resolvable:$true] %s22_s13 }
   0x3   :  { %p62_p1 = scmp.lt.u32.totalorder %s58_s16, %s160_s2 }
   0x5   :  { %p64_p2 = pnand %p62_p1, %p59_p0 }
   0x7   :  { %67 = shalt.err (!%p64_p2)
}
   0x8   :  { %s68_s21 = scalar_lea.vmem %s23_s13, 256  ;;  %p73_p4 = scmp.lt.s32.totalorder %s23_s13, %s23_s13 }
   0x9   :  { %p69_p3 = scmp.ne.s32.totalorder %s23_s13, %s68_s21  ;;  %p74_p5 = scmp.lt.s32.totalorder %s68_s21, %s68_s21 }
   0xb   :  { %p75_p6 = por %p74_p5, %p73_p4 }
   0xd   :  { %p76_p7 = pnand %p75_p6, %p69_p3 }
   0xf   :  { %79 = shalt.err (!%p76_p7)
}
  0x10   :  { %25 = dma.hbm_to_vmem [thread:$0]  %s160_s2, 256, %s23_s13, [#allocation5]  }
  0x11   :  { %102 = dma.done.wait [#allocation5], 256  }
  0x12   :  { %103 = vsyncadd [#allocation5], 4294967040  ;;  %v33_v0 = vstv %s158_s0  ;;  %v31_v1 = vld [vmem:[#allocation4] sm:$0xff]  ;;  %v36_v2 = vstv %s159_s1  ;;  %v32_v3 = vld [vmem:[#allocation4 + $0x8] sm:$0xff]  ;;  %s107_s28 = smov [#allocation7]  }
  0x13   :  { %s47_s29 = sshll.u32 %s107_s28, 4  ;;  %v34_v4 = vmul.f32 %v33_v0, %v31_v1  ;;  %v35_v5 = vmul.f32 %v33_v0, %v32_v3  ;;  %s48_s29 = int_to_ptr.vmem [resolvable:$true] %s47_s29 }
  0x14   :  { %s80_s2 = scalar_lea.vmem %s48_s29, 256  ;;  %p85_p9 = scmp.lt.s32.totalorder %s48_s29, %s48_s29 }
  0x15   :  { %v37_v6 = vadd.f32 %v36_v2, %v34_v4  ;;  %v38_v7 = vadd.f32 %v36_v2, %v35_v5  ;;  %p81_p8 = scmp.ne.s32.totalorder %s48_s29, %s80_s2  ;;  %p86_p10 = scmp.lt.s32.totalorder %s80_s2, %s80_s2 }
  0x17   :  { %39 = vst [vmem:[#allocation7] sm:$0xff] %v37_v6  ;;  %40 = vst [vmem:[#allocation7 + $0x8] sm:$0xff] %v38_v7  ;;  %p87_p11 = por %p86_p10, %p85_p9 }
  0x19   :  { %p88_p12 = pnand %p87_p11, %p81_p8 }
  0x1b   :  { %91 = shalt.err (!%p88_p12)
}
  0x1c   :  { %s92_s1 = scalar_lea.hbm %s161_s3, 256 }
  0x1d   :  { %p93_p13 = scmp.ne.s32.totalorder %s161_s3, %s92_s1  ;;  %p96_p0 = scmp.lt.u32.totalorder %s92_s1, %s161_s3 }
  0x1f   :  { %p98_p1 = pnand %p96_p0, %p93_p13 }
  0x21   :  { %101 = shalt.err (!%p98_p1)
}
  0x22   :  { %50 = dma.vmem_to_hbm [thread:$0]  %s48_s29, 256, %s161_s3, [#allocation6]  }
  0x23   :  { %104 = dma.done.wait [#allocation6], 256  }
  0x24   :  { %105 = vsyncadd [#allocation6], 4294967040 }
  0x25   :  { %54 = vsyncpa [#allocation5], 1 }
  0x26   :  { %55 = vsyncpa [#allocation6], 1 }

</bundles_post_ra>
